<compile_context>
chip_gen: v7x
topology: tpu7x:2x2x1
jax: 0.10.0
libtpu: 0.0.40
codegen_flags: <defaults>
</compile_context>

<pallas_src>
import math

import jax
import jax.numpy as jnp
from jax.experimental import pallas as pl
from jax.experimental.pallas import tpu as pltpu


# ---------------------------------------------------------------------------
# Filterbank construction (setup-time glue, plain JAX; deterministic)
# ---------------------------------------------------------------------------
_F_SP = 200.0 / 3.0
_MIN_LOG_HZ = 1000.0
_LOGSTEP = math.log(6.4) / 27.0
_MIN_LOG_MEL = (_MIN_LOG_HZ - 0.0) / _F_SP


def _hertz2mel(hz):
    hz = jnp.asarray(hz, dtype=jnp.float32)
    mel = (hz - 0.0) / _F_SP
    return jnp.where(
        hz >= _MIN_LOG_HZ,
        _MIN_LOG_MEL + jnp.log(hz / _MIN_LOG_HZ) / _LOGSTEP,
        mel,
    )


def _mel2hertz(mel):
    mel = jnp.asarray(mel, dtype=jnp.float32)
    hz = 0.0 + _F_SP * mel
    return jnp.where(
        mel >= _MIN_LOG_MEL,
        _MIN_LOG_HZ * jnp.exp(_LOGSTEP * (mel - _MIN_LOG_MEL)),
        hz,
    )


def create_fb_matrix(n_freqs, f_min, f_max, n_mels, sample_rate, norm=None):
    if norm is not None and norm != "slaney":
        raise ValueError("norm must be one of None or 'slaney'")
    all_freqs = jnp.linspace(0.0, float(sample_rate // 2), n_freqs, dtype=jnp.float32)
    m_min = _hertz2mel(f_min)
    m_max = _hertz2mel(f_max)
    m_pts = jnp.linspace(m_min, m_max, n_mels + 2, dtype=jnp.float32)
    f_pts = _mel2hertz(m_pts)
    f_diff = f_pts[1:] - f_pts[:-1]
    slopes = f_pts[None, :] - all_freqs[:, None]                   # (n_freqs, n_mels+2)
    down_slopes = -1.0 * slopes[:, :-2] / f_diff[:-1]
    up_slopes = slopes[:, 2:] / f_diff[1:]
    fb = jnp.clip(jnp.minimum(down_slopes, up_slopes), 0.0, None)  # (n_freqs, n_mels)
    if norm is not None and norm == "slaney":
        enorm = 2.0 / (f_pts[2 : n_mels + 2] - f_pts[:n_mels])
        fb = fb * enorm[None, :]
    # TODO(synk): torch emits warnings.warn for all-zero mel rows; omitted here.
    return fb


# ---------------------------------------------------------------------------
# Pallas kernel:  (M, F) @ (F, tT) -> (M, tT)   (native layout, no transposes)
# ---------------------------------------------------------------------------
def _melscale_kernel(fbt_ref, spec_ref, out_ref):
    # fbt_ref: (M, F)   spec_ref: (1, F, tT)   out_ref: (1, M, tT)
    out_ref[0] = jnp.dot(
        fbt_ref[...], spec_ref[0], preferred_element_type=jnp.float32
    ).astype(out_ref.dtype)


_MAX_TILE_T = 512  # multiple of 256 (v6e/v7x MXU width) and 128 (v5e / lane)


def _pick_time_tile(T):
    # Small / short sequences: take the whole axis (block == full dim is legal).
    # Long sequences: 512-wide tiles; remainder handled by pl.cdiv + masked edge.
    return T if T <= _MAX_TILE_T else _MAX_TILE_T


def _melscale_matmul(fb_t, spec_bft):
    """fb_t: (M, F) f32, spec_bft: (B, F, T) f32 -> (B, M, T) f32."""
    M, F = fb_t.shape
    B, F2, T = spec_bft.shape
    assert F == F2, (F, F2)
    tT = _pick_time_tile(T)
    grid = (B, pl.cdiv(T, tT))

    cost = pl.CostEstimate(
        flops=int(2 * B * T * F * M),
        transcendentals=0,
        bytes_accessed=int(4 * (B * F * T + B * M * T + M * F)),
    )

    return pl.pallas_call(
        _melscale_kernel,
        out_shape=jax.ShapeDtypeStruct((B, M, T), spec_bft.dtype),
        grid_spec=pltpu.PrefetchScalarGridSpec(
            num_scalar_prefetch=0,
            grid=grid,
            in_specs=[
                # fb^T: constant index_map -> loaded once, VMEM-resident.
                pl.BlockSpec((M, F), lambda b, t: (0, 0)),
                # spec tile: full freq axis, tT time columns.
                pl.BlockSpec((1, F, tT), lambda b, t: (b, 0, t)),
            ],
            out_specs=pl.BlockSpec((1, M, tT), lambda b, t: (b, 0, t)),
        ),
        compiler_params=pltpu.CompilerParams(
            dimension_semantics=("parallel", "parallel"),
        ),
        cost_estimate=cost,
    )(fb_t, spec_bft)


# ---------------------------------------------------------------------------
# MelScale module wrapper (matches PyTorch forward semantics)
# ---------------------------------------------------------------------------
class MelScale:
    def __init__(self, n_mels=128, sample_rate=16000, f_min=0.0, f_max=None,
                 n_stft=None, norm=None):
        self.n_mels = n_mels
        self.sample_rate = sample_rate
        self.f_max = f_max if f_max is not None else float(sample_rate // 2)
        self.f_min = f_min
        self.norm = norm
        assert f_min <= self.f_max
        self.fb = None       # (F, M), PyTorch convention (kept for parity)
        self._fb_t = None    # (M, F), what the kernel consumes
        if n_stft is not None:
            self.fb = create_fb_matrix(
                n_stft, self.f_min, self.f_max, self.n_mels, self.sample_rate, self.norm
            )
            self._fb_t = jnp.transpose(self.fb)

    def __call__(self, specgram):
        shape = specgram.shape
        spec = specgram.reshape(-1, shape[-2], shape[-1])          # (B, F, T)
        if self._fb_t is None:
            # TODO(synk): lazy fb construction mutates self; pass n_stft at
            # __init__ when wrapping this module in jax.jit.
            self.fb = create_fb_matrix(
                spec.shape[1], self.f_min, self.f_max, self.n_mels,
                self.sample_rate, self.norm,
            )
            self._fb_t = jnp.transpose(self.fb)
        mel = _melscale_matmul(self._fb_t, spec)                   # (B, M, T)
        return mel.reshape(shape[:-2] + mel.shape[-2:])


# ---------------------------------------------------------------------------
if __name__ == "__main__":
    key = jax.random.PRNGKey(0)

    # --- small shapes consistent with the module: batch=2, channels=1,
    #     n_freqs (n_stft) = 65 (n_fft=128), time=16.
    B, C, F, T = 2, 1, 65, 16
    n_mels = 128
    x = jax.random.uniform(key, (B, C, F, T), dtype=jnp.float32)

    mod = MelScale(n_mels=n_mels, sample_rate=16000)
    out = jax.block_until_ready(mod(x))
    assert out.shape == (B, C, n_mels, T), out.shape

    fb = mod.fb
    spec = x.reshape(-1, F, T)
    ref = jnp.matmul(jnp.transpose(spec, (0, 2, 1)), fb)
    ref = jnp.transpose(ref, (0, 2, 1)).reshape(B, C, n_mels, T)
    assert jnp.allclose(out, ref, atol=1e-4, rtol=1e-4), "mismatch vs reference (small)"

    # --- slightly larger shape to exercise the tiled time axis (2 tiles of 512).
    B2, C2, F2, T2 = 1, 1, 201, 1024
    x2 = jax.random.uniform(jax.random.PRNGKey(1), (B2, C2, F2, T2), dtype=jnp.float32)
    mod2 = MelScale(n_mels=n_mels, sample_rate=16000, n_stft=F2)
    out2 = jax.block_until_ready(mod2(x2))
    assert out2.shape == (B2, C2, n_mels, T2), out2.shape

    spec2 = x2.reshape(-1, F2, T2)
    ref2 = jnp.matmul(jnp.transpose(spec2, (0, 2, 1)), mod2.fb)
    ref2 = jnp.transpose(ref2, (0, 2, 1)).reshape(B2, C2, n_mels, T2)
    assert jnp.allclose(out2, ref2, atol=1e-3, rtol=1e-4), "mismatch vs reference (tiled)"

    print("KERNEL_OK")
</pallas_src>

<mosaic_0001>
module attributes {stable_mosaic.version = 11 : i64} {
  func.func @_melscale_kernel(%arg0: i32, %arg1: i32, %arg2: memref<128x65xf32, #tpu.memory_space<vmem>>, %arg3: memref<1x65x16xf32, #tpu.memory_space<vmem>>, %arg4: memref<1x128x16xf32, #tpu.memory_space<vmem>>) attributes {dimension_semantics = [#tpu.dimension_semantics<parallel>, #tpu.dimension_semantics<parallel>], iteration_bounds = array<i64: 2, 1>, scalar_prefetch = 0 : i64, scratch_operands = 0 : i64, tpu.core_type = #tpu.core_type<tc>, window_params = [{pipeline_mode = #tpu.pipeline_mode<synchronous>, transform_indices = @transform_0, window_bounds = array<i64: 128, 65>}, {transform_indices = @transform_1, window_bounds = array<i64: 1, 65, 16>}, {transform_indices = @transform_2, window_bounds = array<i64: 1, 128, 16>}]} {
    %c0 = arith.constant 0 : index
    %c0_0 = arith.constant 0 : index
    %0 = vector.load %arg2[%c0, %c0_0] : memref<128x65xf32, #tpu.memory_space<vmem>>, vector<128x65xf32>
    %c0_1 = arith.constant 0 : index
    %c0_2 = arith.constant 0 : index
    %c0_3 = arith.constant 0 : index
    %1 = vector.load %arg3[%c0_1, %c0_2, %c0_3] : memref<1x65x16xf32, #tpu.memory_space<vmem>>, vector<1x65x16xf32>
    %2 = vector.shape_cast %1 : vector<1x65x16xf32> to vector<65x16xf32>
    %cst = arith.constant dense<0.000000e+00> : vector<128x16xf32>
    %3 = tpu.matmul %0, %2, %cst {dimension_numbers = #tpu.dot_dimension_numbers<[1], [0], [0], [1], [0, 0, 1, 1], [], []>} : vector<128x65xf32>, vector<65x16xf32>, vector<128x16xf32> -> vector<128x16xf32>
    %c0_4 = arith.constant 0 : index
    %c0_5 = arith.constant 0 : index
    %c0_6 = arith.constant 0 : index
    %4 = vector.load %arg4[%c0_4, %c0_5, %c0_6] : memref<1x128x16xf32, #tpu.memory_space<vmem>>, vector<1x128x16xf32>
    %5 = vector.shape_cast %4 : vector<1x128x16xf32> to vector<128x16xf32>
    %6 = vector.shape_cast %3 : vector<128x16xf32> to vector<1x128x16xf32>
    tpu.vector_store %arg4[%c0_4, %c0_5, %c0_6], %6 {strides = array<i32>} : memref<1x128x16xf32, #tpu.memory_space<vmem>>, vector<1x128x16xf32>,
    return
  }
  func.func @transform_0(%arg0: i32, %arg1: i32) -> (i32, i32) {
    %c0_i32 = arith.constant 0 : i32
    %c0_i32_0 = arith.constant 0 : i32
    %c0_i32_1 = arith.constant 0 : i32
    return %c0_i32, %c0_i32_0 : i32, i32
  }
  func.func @transform_1(%arg0: i32, %arg1: i32) -> (i32, i32, i32) {
    %c0_i32 = arith.constant 0 : i32
    %c0_i32_0 = arith.constant 0 : i32
    return %arg0, %c0_i32, %arg1 : i32, i32, i32
  }
  func.func @transform_2(%arg0: i32, %arg1: i32) -> (i32, i32, i32) {
    %c0_i32 = arith.constant 0 : i32
    %c0_i32_0 = arith.constant 0 : i32
    return %arg0, %c0_i32, %arg1 : i32, i32, i32
  }
}

</mosaic_0001>

<bundles_post_ra>
// kernel: tpu_custom_call.1
= control target key start
LH: loop header
LB: loop body
LE: loop exit
PB: predicated region body
PF: predicated region fallthrough
CT: control target
= control target key end

     0   :  { %s683_s9 = smov 0   ;;  %s685_s10 = smov 0   ;;  %s818_s0 = inlined_call_operand.vmem [shape: f32[128,65], index: 0, kind: input, shape index: {}]   ;;  %s819_s1 = inlined_call_operand.vmem [shape: f32[2,65,16], index: 1, kind: input, shape index: {}]   ;;  %s820_s2 = inlined_call_operand.vmem [shape: f32[2,128,16], index: 2, kind: output, shape index: {}]  }
   0x1   :  { %s687_s11 = smov 0  }
   0x2 LB: > { %s24_s12 = sadd.s32 1, %s662_s10  ;;  %p502_p0 = scmp.ge.s32.totalorder %s666_s11, 1  ;;  %s666_s11 = sphi %s687_s11, %s12_s11   ;;  %s662_s10 = sphi %s685_s10, %s822_s10   ;;  %s658_s9 = sphi %s683_s9, %s821_s9  }
   0x3   : > { %p26_p1 = scmp.ge.s32.totalorder %s24_s12, 2  ;;  %p131_p2 = scmp.lt.s32.totalorder %s666_s11, 3 }
   0x5   : > { %s824_s12 = smov (%p26_p1, %s24_s12), 0  ;;  %p132_p3 = pnand %p502_p0, %p131_p2 }
   0x6   : > { %p159_p4 = scmp.lt.s32.totalorder (!%p132_p3), %s658_s9, 1  ;;  %v175_v0 = vld [vmem:[%s818_s0] sm:$0xff] (!%p132_p3)  ;;  %vm200_vm0 = vcmask (!%p132_p3), 531456   ;;  %vm249_vm1 = vcmask (!%p132_p3), 1040384   ;;  %v176_v15 = vld [vmem:[%s818_s0 + $0x8] sm:$0xff] (!%p132_p3)  ;;  %v177_v17 = vld [vmem:[%s818_s0 + $0x10] sm:$0xff] (!%p132_p3) }
   0x7   : > { %135 = sbr.rel (%p132_p3) target bundleno = 265 (0x109), region = 28  ;;  %v183_v1 = vld [vmem:[%s818_s0 + $0x40] sm:$0xff] (!%p132_p3)  ;;  %569 = vmatprep.mubr.msk.f32.mxu0 (!%p132_p3), %vm200_vm0, %v175_v0  ;;  %v184_v16 = vld [vmem:[%s818_s0 + $0x48] sm:$0xff] (!%p132_p3)  ;;  %v185_v18 = vld [vmem:[%s818_s0 + $0x50] sm:$0xff] (!%p132_p3)  ;;  %vm398_vm2 = vcmask (!%p132_p3), 130048  }
   0x8   : > { %581 = vmatprep.mubr.msk.f32.mxu1 (!%p132_p3), %vm200_vm0, %v183_v1  ;;  %v178_v19 = vld [vmem:[%s818_s0 + $0x18] sm:$0xff] (!%p132_p3)  ;;  %v179_v21 = vld [vmem:[%s818_s0 + $0x20] sm:$0xff] (!%p132_p3)  ;;  %v180_v23 = vld [vmem:[%s818_s0 + $0x28] sm:$0xff] (!%p132_p3) }
   0x9   : > { %v186_v20 = vld [vmem:[%s818_s0 + $0x58] sm:$0xff] (!%p132_p3)  ;;  %v187_v22 = vld [vmem:[%s818_s0 + $0x60] sm:$0xff] (!%p132_p3)  ;;  %v188_v24 = vld [vmem:[%s818_s0 + $0x68] sm:$0xff] (!%p132_p3) }
   0xa   : > { %v181_v25 = vld [vmem:[%s818_s0 + $0x30] sm:$0xff] (!%p132_p3)  ;;  %v182_v27 = vld [vmem:[%s818_s0 + $0x38] sm:$0xff] (!%p132_p3) }
   0xb   : > { %v189_v26 = vld [vmem:[%s818_s0 + $0x70] sm:$0xff] (!%p132_p3)  ;;  %v190_v28 = vld [vmem:[%s818_s0 + $0x78] sm:$0xff] (!%p132_p3) }
   0xe   : > { %s826_s9 = smov (!%p159_p4, %s658_s9), 1 }
   0xf   : > { %s619_s17 = smul.u32 72, %s826_s9  ;;  %s525_s25 = sshll.u32 %s826_s9, 7 }
  0x10   : > { %s775_s28 = scalar_lea.vmem %s820_s2, %s525_s25 }
  0x11   : > { %s166_s20 = scalar_lea.vmem %s819_s1, %s619_s17 }
  0x12   : > { %v191_v2 = vld [vmem:[%s166_s20] sm:$0xff]  ;;  %v192_v3 = vld [vmem:[%s166_s20 + $0x8] sm:$0xff]  ;;  %v193_v4 = vld [vmem:[%s166_s20 + $0x10] sm:$0xff] }
  0x13   : > { %v593_v5 = vpack.c.bf16 %v192_v3, %v191_v2  ;;  %v194_v6 = vld [vmem:[%s166_s20 + $0x18] sm:$0xff]  ;;  %v195_v8 = vld [vmem:[%s166_s20 + $0x20] sm:$0xff]  ;;  %v196_v9 = vld [vmem:[%s166_s20 + $0x28] sm:$0xff] }
  0x14   : > { %v597_v7 = vpack.c.bf16 %v194_v6, %v193_v4  ;;  %v601_v10 = vpack.c.bf16 %v196_v9, %v195_v8  ;;  %v197_v11 = vld [vmem:[%s166_s20 + $0x30] sm:$0xff]  ;;  %v198_v12 = vld [vmem:[%s166_s20 + $0x38] sm:$0xff]  ;;  %v199_v14 = vld [vmem:[%s166_s20 + $0x40] sm:$0x1] }
  0x15   : > { %594 = vmatprep.subr.bf16.mxu0 %v593_v5  ;;  %609 = vmatprep.subr.bf16.mxu1 %v593_v5  ;;  %v605_v13 = vpack.c.bf16 %v198_v12, %v197_v11 }
  0x16   : > { %596 = vmatpush3.bf16.msra.mxu0 %v593_v5  ;;  %614 = vmatpush3.bf16.msra.mxu1 %v593_v5 }
  0x17   : > { %598 = vmatprep.subr.bf16.mxu0 %v597_v7  ;;  %610 = vmatprep.subr.bf16.mxu1 %v597_v7 }
  0x1a   : > { %600 = vmatpush3.bf16.msra.mxu0 %v597_v7  ;;  %615 = vmatpush3.bf16.msra.mxu1 %v597_v7 }
  0x1b   : > { %602 = vmatprep.subr.bf16.mxu0 %v601_v10  ;;  %611 = vmatprep.subr.bf16.mxu1 %v601_v10 }
  0x1e   : > { %604 = vmatpush3.bf16.msra.mxu0 %v601_v10  ;;  %616 = vmatpush3.bf16.msra.mxu1 %v601_v10 }
  0x1f   : > { %606 = vmatprep.subr.bf16.mxu0 %v605_v13  ;;  %612 = vmatprep.subr.bf16.mxu1 %v605_v13 }
  0x22   : > { %608 = vmatpush3.bf16.msra.mxu0 %v605_v13  ;;  %617 = vmatpush3.bf16.msra.mxu1 %v605_v13 }
  0x23   : > { %567 = vmatprep.subr.msk.mxu0 %vm249_vm1, %v199_v14  ;;  %613 = vmatprep.subr.msk.mxu1 %vm249_vm1, %v199_v14 }
  0x26   : > { %568 = vmatpush3.msk.msra.mxu0 %vm249_vm1, %v199_v14  ;;  %618 = vmatpush3.msk.msra.mxu1 %vm249_vm1, %v199_v14 }
  0x27   : > { %570 = vmatmul.mubr.msk.f32.vlgmr.msra.gmra.mrb[0].mxu0 %vm200_vm0, %v176_v15  ;;  %582 = vmatmul.mubr.msk.f32.vlgmr.msra.gmra.mrb[0].mxu1 %vm200_vm0, %v184_v16 }
  0x28   : > { %572 = vmatprep.mubr.msk.f32.mxu0 %vm200_vm0, %v177_v17  ;;  %584 = vmatprep.mubr.msk.f32.mxu1 %vm200_vm0, %v185_v18 }
  0x2b   : > { %573 = vmatmul.mubr.msk.f32.gmra.mrb[2].mxu0 %vm200_vm0, %v178_v19  ;;  %585 = vmatmul.mubr.msk.f32.gmra.mrb[2].mxu1 %vm200_vm0, %v186_v20 }
  0x2c   : > { %575 = vmatprep.mubr.msk.f32.mxu0 %vm200_vm0, %v179_v21  ;;  %587 = vmatprep.mubr.msk.f32.mxu1 %vm200_vm0, %v187_v22 }
  0x2f   : > { %576 = vmatmul.mubr.msk.f32.gmra.mrb[4].mxu0 %vm200_vm0, %v180_v23  ;;  %588 = vmatmul.mubr.msk.f32.gmra.mrb[4].mxu1 %vm200_vm0, %v188_v24 }
  0x30   : > { %578 = vmatprep.mubr.msk.f32.mxu0 %vm200_vm0, %v181_v25  ;;  %590 = vmatprep.mubr.msk.f32.mxu1 %vm200_vm0, %v189_v26 }
  0x33   : > { %579 = vmatmul.mubr.msk.f32.gmra.mrb[6].mxu0 %vm200_vm0, %v182_v27  ;;  %591 = vmatmul.mubr.msk.f32.gmra.mrb[6].mxu1 %vm200_vm0, %v190_v28 }
  0xfa   : > { %v571_v29 = vpop.f32.mrb[0].mxu0  ;;  %v583_v30 = vpop.f32.mrb[0].mxu1 }
  0xfb   : > { %400 = vst.msk [vmem:[%s775_s28 + $0x8] sm:$0xff] %vm398_vm2, %v571_v29  ;;  %408 = vst.msk [vmem:[%s775_s28 + $0x48] sm:$0xff] %vm398_vm2, %v583_v30  ;;  %v319_v31 = vpop.f32.mrb[1].mxu0  ;;  %v359_v32 = vpop.f32.mrb[1].mxu1 }
  0xfc   : > { %399 = vst.msk [vmem:[%s775_s28] sm:$0xff] %vm398_vm2, %v319_v31  ;;  %407 = vst.msk [vmem:[%s775_s28 + $0x40] sm:$0xff] %vm398_vm2, %v359_v32 }
  0xfe   : > { %v574_v33 = vpop.f32.mrb[2].mxu0  ;;  %v586_v34 = vpop.f32.mrb[2].mxu1 }
  0xff   : > { %402 = vst.msk [vmem:[%s775_s28 + $0x18] sm:$0xff] %vm398_vm2, %v574_v33  ;;  %410 = vst.msk [vmem:[%s775_s28 + $0x58] sm:$0xff] %vm398_vm2, %v586_v34  ;;  %v329_v35 = vpop.f32.mrb[3].mxu0  ;;  %v369_v36 = vpop.f32.mrb[3].mxu1 }
 0x100   : > { %401 = vst.msk [vmem:[%s775_s28 + $0x10] sm:$0xff] %vm398_vm2, %v329_v35  ;;  %409 = vst.msk [vmem:[%s775_s28 + $0x50] sm:$0xff] %vm398_vm2, %v369_v36 }
 0x102   : > { %v577_v37 = vpop.f32.mrb[4].mxu0  ;;  %v589_v38 = vpop.f32.mrb[4].mxu1 }
 0x103   : > { %404 = vst.msk [vmem:[%s775_s28 + $0x28] sm:$0xff] %vm398_vm2, %v577_v37  ;;  %412 = vst.msk [vmem:[%s775_s28 + $0x68] sm:$0xff] %vm398_vm2, %v589_v38  ;;  %v339_v39 = vpop.f32.mrb[5].mxu0  ;;  %v379_v40 = vpop.f32.mrb[5].mxu1 }
 0x104   : > { %403 = vst.msk [vmem:[%s775_s28 + $0x20] sm:$0xff] %vm398_vm2, %v339_v39  ;;  %411 = vst.msk [vmem:[%s775_s28 + $0x60] sm:$0xff] %vm398_vm2, %v379_v40 }
 0x106   : > { %v580_v41 = vpop.f32.mrb[6].mxu0  ;;  %v592_v42 = vpop.f32.mrb[6].mxu1 }
 0x107   : > { %406 = vst.msk [vmem:[%s775_s28 + $0x38] sm:$0xff] %vm398_vm2, %v580_v41  ;;  %414 = vst.msk [vmem:[%s775_s28 + $0x78] sm:$0xff] %vm398_vm2, %v592_v42  ;;  %v349_v43 = vpop.f32.mrb[7].mxu0  ;;  %v389_v44 = vpop.f32.mrb[7].mxu1 }
 0x108   : > { %405 = vst.msk [vmem:[%s775_s28 + $0x30] sm:$0xff] %vm398_vm2, %v349_v43  ;;  %413 = vst.msk [vmem:[%s775_s28 + $0x70] sm:$0xff] %vm398_vm2, %v389_v44 }
 0x109 PF: > { %s12_s11 = sadd.s32 1, %s666_s11   ;;  %s821_s9 = smov %s662_s10 }
 0x10a   : > { %p9_p5 = scmp.ge.s32.totalorder %s12_s11, 4   ;;  %s822_s10 = smov %s824_s12 }
 0x10c   :  { %11 = sbr.rel (!%p9_p5) target bundleno = 2 (0x2), region = 58 }

</bundles_post_ra>
